<compile_context>
chip_gen: v7x
topology: tpu7x:2x2x1
jax: 0.10.0
libtpu: 0.0.40
codegen_flags: <defaults>
</compile_context>

<pallas_src>
import math
import functools

import jax
import jax.numpy as jnp
from jax.experimental import pallas as pl
from jax.experimental.pallas import tpu as pltpu

PAD_IDX = 0
FF_MULT = 4          # FeedForwardLayer hidden dim = FF_MULT * n_embd
LN_EPS = 1e-6
NEG_INF = -1e9

TILE_M = 512
TILE_N = 512
TILE_K = 512


def _vmem_limit_bytes():
    """Scoped-VMEM budget: ~3/4 of physical, capped at 100 MiB, floor 32 MiB."""
    phys = 128 * 1024 * 1024
    try:
        info = pltpu.get_tpu_info()
        p = int(getattr(info, "vmem_capacity_bytes", phys))
        if p > 0:
            phys = p
    except Exception:
        pass
    return int(max(32 * 1024 * 1024, min(100 * 1024 * 1024, phys * 3 // 4)))


VMEM_LIMIT = _vmem_limit_bytes()


def _round_up(x, m):
    return (x + m - 1) // m * m


def _pick_tile(dim, target):
    """Return (tile, padded_dim).  Full-dim block when dim <= target."""
    if dim <= target:
        return dim, dim
    return target, _round_up(dim, target)


# --------------------------------------------------------------------------
# Pallas kernels
# --------------------------------------------------------------------------

def _matmul_kernel(x_ref, w_ref, b_ref, *rest, activation, has_residual):
    if has_residual:
        r_ref, o_ref, acc_ref = rest
    else:
        o_ref, acc_ref = rest

    k = pl.program_id(2)

    @pl.when(k == 0)
    def _():
        acc_ref[...] = jnp.zeros_like(acc_ref)

    # Operands arrive as bf16 (native MXU input); f32 accumulation in VMEM.
    acc_ref[...] += jnp.dot(x_ref[...], w_ref[...],
                            preferred_element_type=jnp.float32)

    @pl.when(k == pl.num_programs(2) - 1)
    def _():
        y = acc_ref[...] + b_ref[...]                 # bias kept f32
        if activation == "relu":
            y = jnp.maximum(y, 0.0)
        if has_residual:
            y = y + r_ref[...].astype(jnp.float32)
        o_ref[...] = y.astype(o_ref.dtype)


def linear(x, p, activation=None, residual=None):
    """y = act(x @ w + b) (+ residual).

    x: (M, K) activations.  p: prepped dense dict with pre-padded bf16 "w"
    (Kp, Np), f32 "b" (1, Np), and original dims "in"/"out".
    """
    w, b = p["w"], p["b"]
    K, N = p["in"], p["out"]
    Kp, Np = w.shape
    M = x.shape[0]

    tm, Mp = _pick_tile(M, TILE_M)
    tk = TILE_K if Kp > TILE_K else Kp
    tn = TILE_N if Np > TILE_N else Np

    x = x.astype(jnp.bfloat16)
    if Mp != M or Kp != K:
        x = jnp.pad(x, ((0, Mp - M), (0, Kp - K)))

    args = [x, w, b]
    in_specs = [
        pl.BlockSpec((tm, tk), lambda i, j, k: (i, k)),
        pl.BlockSpec((tk, tn), lambda i, j, k: (k, j)),
        pl.BlockSpec((1, tn), lambda i, j, k: (0, j)),
    ]

    has_residual = residual is not None
    if has_residual:
        r = residual.astype(jnp.bfloat16)
        if Mp != M or Np != N:
            r = jnp.pad(r, ((0, Mp - M), (0, Np - N)))
        args.append(r)
        in_specs.append(pl.BlockSpec((tm, tn), lambda i, j, k: (i, j)))

    kernel = functools.partial(_matmul_kernel, activation=activation,
                               has_residual=has_residual)

    out = pl.pallas_call(
        kernel,
        out_shape=jax.ShapeDtypeStruct((Mp, Np), jnp.bfloat16),
        grid=(Mp // tm, Np // tn, Kp // tk),
        in_specs=in_specs,
        out_specs=pl.BlockSpec((tm, tn), lambda i, j, k: (i, j)),
        scratch_shapes=[pltpu.VMEM((tm, tn), jnp.float32)],
        compiler_params=pltpu.CompilerParams(
            dimension_semantics=("parallel", "parallel", "arbitrary"),
            vmem_limit_bytes=VMEM_LIMIT),
    )(*args)

    if Mp != M or Np != N:
        out = out[:M, :N]
    return out


def _layernorm_kernel(x_ref, g_ref, b_ref, o_ref):
    x = x_ref[...].astype(jnp.float32)
    mean = jnp.mean(x, axis=-1, keepdims=True)
    var = jnp.mean(jnp.square(x - mean), axis=-1, keepdims=True)
    inv = jax.lax.rsqrt(var + LN_EPS)
    o_ref[...] = ((x - mean) * inv * g_ref[...] + b_ref[...]).astype(o_ref.dtype)


def layer_norm(x, gamma, beta):
    """Row-tiled LayerNorm over the last dim.  x: (M, D) -> bf16 output."""
    M, D = x.shape
    tm, Mp = _pick_tile(M, TILE_M)
    xp = x if Mp == M else jnp.pad(x, ((0, Mp - M), (0, 0)))

    out = pl.pallas_call(
        _layernorm_kernel,
        out_shape=jax.ShapeDtypeStruct((Mp, D), jnp.bfloat16),
        grid=(Mp // tm,),
        in_specs=[
            pl.BlockSpec((tm, D), lambda i: (i, 0)),
            pl.BlockSpec((1, D), lambda i: (0, 0)),
            pl.BlockSpec((1, D), lambda i: (0, 0)),
        ],
        out_specs=pl.BlockSpec((tm, D), lambda i: (i, 0)),
        compiler_params=pltpu.CompilerParams(
            dimension_semantics=("parallel",),
            vmem_limit_bytes=VMEM_LIMIT),
    )(xp, gamma.reshape(1, D), beta.reshape(1, D))

    return out if Mp == M else out[:M]


def _attn_bias(keep_row, Tq, Tk, causal):
    """Additive f32 bias built in-kernel from a (1, Tk) keep mask (+ causal)."""
    keep = keep_row != 0                                       # (1, Tk) bool
    if causal:
        rows = jax.lax.broadcasted_iota(jnp.int32, (Tq, Tk), 0)
        cols = jax.lax.broadcasted_iota(jnp.int32, (Tq, Tk), 1)
        keep = jnp.logical_and(keep, cols <= rows)             # (Tq, Tk)
    return jnp.where(keep, 0.0, NEG_INF).astype(jnp.float32)


def _attn_heads(q_all, k_all, v_all, bias, n_head, scale):
    """Per-head attention on bf16 (T*, d) slabs; returns lane-dense (Tq, d) f32."""
    d = q_all.shape[-1]
    dk = d // n_head
    outs = []
    for h in range(n_head):                     # static unroll, static lane slices
        lo, hi = h * dk, (h + 1) * dk
        q = q_all[:, lo:hi]                     # (Tq, dk) bf16
        k = k_all[:, lo:hi]                     # (Tk, dk) bf16
        v = v_all[:, lo:hi]                     # (Tk, dk) bf16
        # Contract the shared minor dim directly -- no k.T materialized.
        s = jax.lax.dot_general(q, k, (((1,), (1,)), ((), ())),
                                preferred_element_type=jnp.float32) * scale
        s = s + bias
        m = jnp.max(s, axis=-1, keepdims=True)
        p = jnp.exp(s - m)
        denom = jnp.sum(p, axis=-1, keepdims=True)
        p = p * pl.reciprocal(denom, approx=True)     # EUP slot, not VALU divide
        outs.append(jnp.dot(p.astype(jnp.bfloat16), v,
                            preferred_element_type=jnp.float32))
    return jnp.concatenate(outs, axis=-1)             # (Tq, H*dk) lane-dense
    # TODO(synk): for long sequences switch to a flash/online-softmax form with
    # a (B, H, Tk) grid + m/l/acc scratch so per-step VMEM stays flat and both
    # v7x TensorCores get parallel iterations even at B=1.


def _self_attn_kernel(qkv_ref, pmask_ref, o_ref, *, n_head, causal, scale):
    d = o_ref.shape[-1]
    Tq = o_ref.shape[1]
    qkv = qkv_ref[0]                                   # (Tq, 3d) bf16
    bias = _attn_bias(pmask_ref[0], Tq, Tq, causal)
    o = _attn_heads(qkv[:, :d], qkv[:, d:2 * d], qkv[:, 2 * d:],
                    bias, n_head, scale)
    o_ref[0] = o.astype(o_ref.dtype)


def _cross_attn_kernel(q_ref, kv_ref, pmask_ref, o_ref, *, n_head, scale):
    d = o_ref.shape[-1]
    Tq = o_ref.shape[1]
    Tk = kv_ref.shape[1]
    q = q_ref[0]                                       # (Tq, d) bf16
    kv = kv_ref[0]                                     # (Tk, 2d) bf16
    bias = _attn_bias(pmask_ref[0], Tq, Tk, causal=False)
    o = _attn_heads(q, kv[:, :d], kv[:, d:], bias, n_head, scale)
    o_ref[0] = o.astype(o_ref.dtype)


def self_attention(qkv, pad_mask, n_head, causal):
    """qkv: (B, T, 3d) bf16 fused projection.  pad_mask: (B, 1, T) int32 keep."""
    B, T, d3 = qkv.shape
    d = d3 // 3
    kernel = functools.partial(_self_attn_kernel, n_head=n_head, causal=causal,
                               scale=1.0 / math.sqrt(d // n_head))
    return pl.pallas_call(
        kernel,
        out_shape=jax.ShapeDtypeStruct((B, T, d), jnp.bfloat16),
        grid=(B,),
        in_specs=[
            pl.BlockSpec((1, T, d3), lambda b: (b, 0, 0)),
            pl.BlockSpec((1, 1, T), lambda b: (b, 0, 0)),
        ],
        out_specs=pl.BlockSpec((1, T, d), lambda b: (b, 0, 0)),
        compiler_params=pltpu.CompilerParams(
            dimension_semantics=("parallel",),
            vmem_limit_bytes=VMEM_LIMIT),
    )(qkv, pad_mask)


def cross_attention(q, kv, pad_mask, n_head):
    """q: (B, Tq, d) bf16.  kv: (B, Tk, 2d) bf16.  pad_mask: (B, 1, Tk) int32."""
    B, Tq, d = q.shape
    Tk = kv.shape[1]
    kernel = functools.partial(_cross_attn_kernel, n_head=n_head,
                               scale=1.0 / math.sqrt(d // n_head))
    return pl.pallas_call(
        kernel,
        out_shape=jax.ShapeDtypeStruct((B, Tq, d), jnp.bfloat16),
        grid=(B,),
        in_specs=[
            pl.BlockSpec((1, Tq, d), lambda b: (b, 0, 0)),
            pl.BlockSpec((1, Tk, 2 * d), lambda b: (b, 0, 0)),
            pl.BlockSpec((1, 1, Tk), lambda b: (b, 0, 0)),
        ],
        out_specs=pl.BlockSpec((1, Tq, d), lambda b: (b, 0, 0)),
        compiler_params=pltpu.CompilerParams(
            dimension_semantics=("parallel",),
            vmem_limit_bytes=VMEM_LIMIT),
    )(q, kv, pad_mask)


# --------------------------------------------------------------------------
# Parameter init (deterministic, PyTorch-Linear-style uniform)
# --------------------------------------------------------------------------

def _dense(key, fan_in, fan_out):
    wk, bk = jax.random.split(key)
    bound = 1.0 / math.sqrt(fan_in)
    w = jax.random.uniform(wk, (fan_in, fan_out), jnp.float32, -bound, bound)
    b = jax.random.uniform(bk, (fan_out,), jnp.float32, -bound, bound)
    # One-time tile-pad + bf16 cast so linear() never re-pads/re-casts weights.
    _, Kp = _pick_tile(fan_in, TILE_K)
    _, Np = _pick_tile(fan_out, TILE_N)
    if Kp != fan_in or Np != fan_out:
        w = jnp.pad(w, ((0, Kp - fan_in), (0, Np - fan_out)))
    if Np != fan_out:
        b = jnp.pad(b, (0, Np - fan_out))
    return {"w": w.astype(jnp.bfloat16), "b": b.reshape(1, Np),
            "in": fan_in, "out": fan_out}


def _norm(d):
    return {"g": jnp.ones((d,), jnp.float32), "b": jnp.zeros((d,), jnp.float32)}


def _self_attn_params(key, d):
    k = jax.random.split(key, 2)
    # Q|K|V fused along the output dim -> one projection matmul per sublayer.
    return {"wqkv": _dense(k[0], d, 3 * d), "wo": _dense(k[1], d, d)}


def _cross_attn_params(key, d):
    k = jax.random.split(key, 3)
    return {"wq": _dense(k[0], d, d), "wkv": _dense(k[1], d, 2 * d),
            "wo": _dense(k[2], d, d)}


def _ff_params(key, d):
    k = jax.random.split(key, 2)
    return {"w1": _dense(k[0], d, FF_MULT * d), "w2": _dense(k[1], FF_MULT * d, d)}


def init_transformer_params(key, src_vocab, tgt_vocab, n_embd, n_layer):
    keys = iter(jax.random.split(key, 8 + 8 * n_layer))
    enc_layers, dec_layers = [], []
    for _ in range(n_layer):
        enc_layers.append({
            "self_attn": _self_attn_params(next(keys), n_embd),
            "ff": _ff_params(next(keys), n_embd),
            "norm1": _norm(n_embd), "norm2": _norm(n_embd),
        })
    for _ in range(n_layer):
        dec_layers.append({
            "self_attn": _self_attn_params(next(keys), n_embd),
            "src_attn": _cross_attn_params(next(keys), n_embd),
            "ff": _ff_params(next(keys), n_embd),
            "norm1": _norm(n_embd), "norm2": _norm(n_embd), "norm3": _norm(n_embd),
        })
    return {
        "src_emb": jax.random.normal(next(keys), (src_vocab, n_embd), jnp.float32),
        "tgt_emb": jax.random.normal(next(keys), (tgt_vocab, n_embd), jnp.float32),
        "encoder": {"layers": enc_layers, "norm": _norm(n_embd)},
        "decoder": {"layers": dec_layers, "norm": _norm(n_embd)},
        "generator": _dense(next(keys), n_embd, tgt_vocab),
    }


# --------------------------------------------------------------------------
# Model glue (plain JAX around the Pallas kernels)
# --------------------------------------------------------------------------

def positional_encoding(max_len, d):
    pos = jnp.arange(max_len, dtype=jnp.float32)[:, None]
    div = jnp.exp(jnp.arange(0, d, 2, dtype=jnp.float32) * (-math.log(10000.0) / d))
    pe = jnp.zeros((max_len, d), jnp.float32)
    pe = pe.at[:, 0::2].set(jnp.sin(pos * div))
    pe = pe.at[:, 1::2].set(jnp.cos(pos * div))
    return pe


def embed(tokens, emb_table, pe):
    d = emb_table.shape[1]
    x = jnp.take(emb_table, tokens, axis=0) * math.sqrt(d)   # Embeddings * sqrt(d)
    x = x + pe[None, : tokens.shape[1], :]                   # PositionalEncoding
    return x.astype(jnp.bfloat16)
    # TODO(synk): dropout after positional encoding is identity (eval mode).


def make_src_mask(src):
    return (src != PAD_IDX).astype(jnp.int32)[:, None, :]            # (B,1,Ts)


def make_tgt_mask(tgt):
    B, T = tgt.shape
    pad = (tgt != PAD_IDX).astype(jnp.int32)[:, None, :]              # (B,1,T)
    sub = jnp.tril(jnp.ones((T, T), jnp.int32))[None]                 # (1,T,T)
    return pad * sub                                                  # (B,T,T)


def _ln(p, x):
    B, T, d = x.shape
    return layer_norm(x.reshape(B * T, d), p["g"], p["b"]).reshape(B, T, d)


def _mha_self(p, xn, x_resid, pad_mask, n_head, causal):
    """Pre-LN self-attention: fused QKV, in-kernel heads, fused residual add."""
    B, T, d = xn.shape
    qkv = linear(xn.reshape(B * T, d), p["wqkv"])                     # (B*T, 3d)
    o = self_attention(qkv.reshape(B, T, 3 * d), pad_mask, n_head, causal)
    y = linear(o.reshape(B * T, d), p["wo"],
               residual=x_resid.reshape(B * T, d))
    return y.reshape(B, T, d)


def _mha_cross(p, xn, x_resid, memory, pad_mask, n_head):
    """Pre-LN cross-attention: Q from xn, fused K|V from memory."""
    B, Tq, d = xn.shape
    Ts = memory.shape[1]
    q = linear(xn.reshape(B * Tq, d), p["wq"]).reshape(B, Tq, d)
    kv = linear(memory.reshape(B * Ts, d), p["wkv"]).reshape(B, Ts, 2 * d)
    o = cross_attention(q, kv, pad_mask, n_head)
    y = linear(o.reshape(B * Tq, d), p["wo"],
               residual=x_resid.reshape(B * Tq, d))
    return y.reshape(B, Tq, d)


def _ff(p, xn, x_resid):
    B, T, d = xn.shape
    h = linear(xn.reshape(B * T, d), p["w1"], activation="relu")
    y = linear(h, p["w2"], residual=x_resid.reshape(B * T, d))
    return y.reshape(B, T, d)


def encoder(params, x, src_pad, n_head):
    for lp in params["layers"]:
        xn = _ln(lp["norm1"], x)
        x = _mha_self(lp["self_attn"], xn, x, src_pad, n_head, causal=False)
        xn = _ln(lp["norm2"], x)
        x = _ff(lp["ff"], xn, x)
    return _ln(params["norm"], x)


def decoder(params, x, memory, src_pad, tgt_pad, n_head):
    for lp in params["layers"]:
        xn = _ln(lp["norm1"], x)
        x = _mha_self(lp["self_attn"], xn, x, tgt_pad, n_head, causal=True)
        xn = _ln(lp["norm2"], x)
        x = _mha_cross(lp["src_attn"], xn, x, memory, src_pad, n_head)
        xn = _ln(lp["norm3"], x)
        x = _ff(lp["ff"], xn, x)
    return _ln(params["norm"], x)


def transformer_forward(params, src, tgt, src_mask, tgt_mask, pe, n_head):
    # NOTE: matching the PyTorch module, the passed-in tgt_mask is ignored;
    # decode() recomputes it from tgt/PAD_IDX (key pad + causal, applied
    # additively inside the attention kernel).
    del tgt_mask
    src_pad = src_mask.astype(jnp.int32)                          # (B,1,Ts) keep
    tgt_pad = (tgt != PAD_IDX).astype(jnp.int32)[:, None, :]      # (B,1,Tt) keep

    enc = encoder(params["encoder"], embed(src, params["src_emb"], pe),
                  src_pad, n_head)
    dec = decoder(params["decoder"], embed(tgt, params["tgt_emb"], pe),
                  enc, src_pad, tgt_pad, n_head)
    B, Tt, d = dec.shape
    gen = params["generator"]
    logits = linear(dec.reshape(B * Tt, d), gen)
    return logits.reshape(B, Tt, gen["out"])


# --------------------------------------------------------------------------

if __name__ == "__main__":
    # Small shapes consistent with the module's forward.
    B, Ts, Tt = 2, 8, 8
    src_vocab, tgt_vocab = 40, 48
    n_embd, n_head, n_layer, max_seq_len = 32, 4, 2, 16

    key = jax.random.PRNGKey(0)
    kp, ks, kt = jax.random.split(key, 3)

    params = init_transformer_params(kp, src_vocab, tgt_vocab, n_embd, n_layer)
    pe = positional_encoding(max_seq_len, n_embd)

    src = jax.random.randint(ks, (B, Ts), 1, src_vocab, dtype=jnp.int32)
    tgt = jax.random.randint(kt, (B, Tt), 1, tgt_vocab, dtype=jnp.int32)
    # add a couple of pad tokens to exercise masking
    src = src.at[0, -1].set(PAD_IDX)
    tgt = tgt.at[1, -2:].set(PAD_IDX)

    src_mask = make_src_mask(src)          # (B,1,Ts)
    tgt_mask = make_tgt_mask(tgt)          # (B,Tt,Tt) -- ignored, as in reference

    out = transformer_forward(params, src, tgt, src_mask, tgt_mask, pe, n_head)
    out = jax.block_until_ready(out)

    assert out.shape == (B, Tt, tgt_vocab), out.shape
    assert jnp.all(jnp.isfinite(out.astype(jnp.float32)))
    print("KERNEL_OK")
</pallas_src>

<mosaic_0001>
module attributes {stable_mosaic.version = 11 : i64} {
  func.func @_layernorm_kernel(%arg0: i32, %arg1: memref<16x32xbf16, #tpu.memory_space<vmem>>, %arg2: memref<1x32xf32, #tpu.memory_space<vmem>>, %arg3: memref<1x32xf32, #tpu.memory_space<vmem>>, %arg4: memref<16x32xbf16, #tpu.memory_space<vmem>>) attributes {dimension_semantics = [#tpu.dimension_semantics<parallel>], iteration_bounds = array<i64: 1>, scalar_prefetch = 0 : i64, scratch_operands = 0 : i64, tpu.core_type = #tpu.core_type<tc>, window_params = [{transform_indices = @transform_0, window_bounds = array<i64: 16, 32>}, {pipeline_mode = #tpu.pipeline_mode<synchronous>, transform_indices = @transform_1, window_bounds = array<i64: 1, 32>}, {pipeline_mode = #tpu.pipeline_mode<synchronous>, transform_indices = @transform_2, window_bounds = array<i64: 1, 32>}, {transform_indices = @transform_3, window_bounds = array<i64: 16, 32>}]} {
    %c0 = arith.constant 0 : index
    %c0_0 = arith.constant 0 : index
    %0 = vector.load %arg1[%c0, %c0_0] : memref<16x32xbf16, #tpu.memory_space<vmem>>, vector<16x32xbf16>
    %1 = arith.extf %0 : vector<16x32xbf16> to vector<16x32xf32>
    %cst = arith.constant dense<0.000000e+00> : vector<16xf32>
    %2 = vector.multi_reduction <add>, %1, %cst [1] : vector<16x32xf32> to vector<16xf32>
    %3 = vector.shape_cast %2 : vector<16xf32> to vector<16x1xf32>
    %cst_1 = arith.constant 3.200000e+01 : f32
    %4 = vector.broadcast %cst_1 : f32 to vector<16x1xf32>
    %5 = arith.divf %3, %4 : vector<16x1xf32>
    %6 = vector.broadcast %5 : vector<16x1xf32> to vector<16x32xf32>
    %7 = arith.subf %1, %6 : vector<16x32xf32>
    %8 = arith.mulf %7, %7 : vector<16x32xf32>
    %cst_2 = arith.constant dense<0.000000e+00> : vector<16xf32>
    %9 = vector.multi_reduction <add>, %8, %cst_2 [1] : vector<16x32xf32> to vector<16xf32>
    %10 = vector.shape_cast %9 : vector<16xf32> to vector<16x1xf32>
    %cst_3 = arith.constant 3.200000e+01 : f32
    %11 = vector.broadcast %cst_3 : f32 to vector<16x1xf32>
    %12 = arith.divf %10, %11 : vector<16x1xf32>
    %cst_4 = arith.constant 9.99999997E-7 : f32
    %13 = vector.broadcast %cst_4 : f32 to vector<16x1xf32>
    %14 = arith.addf %12, %13 : vector<16x1xf32>
    %15 = math.rsqrt %14 : vector<16x1xf32>
    %16 = vector.broadcast %5 : vector<16x1xf32> to vector<16x32xf32>
    %17 = arith.subf %1, %16 : vector<16x32xf32>
    %18 = vector.broadcast %15 : vector<16x1xf32> to vector<16x32xf32>
    %19 = arith.mulf %17, %18 : vector<16x32xf32>
    %c0_5 = arith.constant 0 : index
    %c0_6 = arith.constant 0 : index
    %20 = vector.load %arg2[%c0_5, %c0_6] : memref<1x32xf32, #tpu.memory_space<vmem>>, vector<1x32xf32>
    %21 = vector.broadcast %20 : vector<1x32xf32> to vector<16x32xf32>
    %22 = arith.mulf %19, %21 : vector<16x32xf32>
    %c0_7 = arith.constant 0 : index
    %c0_8 = arith.constant 0 : index
    %23 = vector.load %arg3[%c0_7, %c0_8] : memref<1x32xf32, #tpu.memory_space<vmem>>, vector<1x32xf32>
    %24 = vector.broadcast %23 : vector<1x32xf32> to vector<16x32xf32>
    %25 = arith.addf %22, %24 : vector<16x32xf32>
    %26 = arith.truncf %25 : vector<16x32xf32> to vector<16x32xbf16>
    %c0_9 = arith.constant 0 : index
    %c0_10 = arith.constant 0 : index
    %27 = vector.load %arg4[%c0_9, %c0_10] : memref<16x32xbf16, #tpu.memory_space<vmem>>, vector<16x32xbf16>
    tpu.vector_store %arg4[%c0_9, %c0_10], %26 {strides = array<i32>} : memref<16x32xbf16, #tpu.memory_space<vmem>>, vector<16x32xbf16>,
    return
  }
  func.func @transform_0(%arg0: i32) -> (i32, i32) {
    %c0_i32 = arith.constant 0 : i32
    %c0_i32_0 = arith.constant 0 : i32
    return %arg0, %c0_i32 : i32, i32
  }
  func.func @transform_1(%arg0: i32) -> (i32, i32) {
    %c0_i32 = arith.constant 0 : i32
    %c0_i32_0 = arith.constant 0 : i32
    %c0_i32_1 = arith.constant 0 : i32
    return %c0_i32, %c0_i32_0 : i32, i32
  }
  func.func @transform_2(%arg0: i32) -> (i32, i32) {
    %c0_i32 = arith.constant 0 : i32
    %c0_i32_0 = arith.constant 0 : i32
    %c0_i32_1 = arith.constant 0 : i32
    return %c0_i32, %c0_i32_0 : i32, i32
  }
  func.func @transform_3(%arg0: i32) -> (i32, i32) {
    %c0_i32 = arith.constant 0 : i32
    %c0_i32_0 = arith.constant 0 : i32
    return %arg0, %c0_i32 : i32, i32
  }
}

</mosaic_0001>

<bundles_post_ra>
// kernel: tpu_custom_call.1
= control target key start
LH: loop header
LB: loop body
LE: loop exit
PB: predicated region body
PF: predicated region fallthrough
CT: control target
= control target key end

     0   :  { %8 = vsyncpa [#allocation3], 0  ;;  %s336_s0 = inlined_call_operand.hbm [shape: bf16[16,32], index: 0, kind: input, shape index: {}]   ;;  %s337_s1 = inlined_call_operand.hbm [shape: f32[1,32], index: 1, kind: input, shape index: {}]   ;;  %s338_s2 = inlined_call_operand.hbm [shape: f32[1,32], index: 2, kind: input, shape index: {}]   ;;  %s339_s3 = inlined_call_operand.hbm [shape: bf16[16,32], index: 3, kind: output, shape index: {}]  }
   0x1   :  { %9 = vsyncpa [#allocation6], 0 }
   0x2   :  { %10 = vsyncpa [#allocation4], 0  ;;  %s245_s12 = smov [#allocation5]   ;;  %s246_s14 = smov [#allocation2]  }
   0x3   :  { %s29_s13 = sshll.u32 %s245_s12, 4  ;;  %s16_s15 = sshll.u32 %s246_s14, 4  ;;  %s30_s13 = int_to_ptr.vmem [resolvable:$true] %s29_s13  ;;  %s271_s15 = int_to_ptr.vmem [resolvable:$true] %s16_s15 }
   0x4   :  { %s151_s18 = scalar_lea.hbm %s337_s1, 16 }
   0x5   :  { %p152_p0 = scmp.ne.s32.totalorder %s337_s1, %s151_s18  ;;  %p155_p1 = scmp.lt.u32.totalorder %s151_s18, %s337_s1 }
   0x7   :  { %p157_p2 = pnand %p155_p1, %p152_p0 }
   0x9   :  { %160 = shalt.err (!%p157_p2)
}
   0xa   :  { %s161_s23 = scalar_lea.vmem %s30_s13, 16  ;;  %s165_s24 = scalar_lea.vmem %s30_s13, 32 }
   0xb   :  { %p162_p3 = scmp.ne.s32.totalorder %s30_s13, %s161_s23  ;;  %p166_p4 = scmp.lt.s32.totalorder %s30_s13, %s30_s13 }
   0xc   :  { %p167_p5 = scmp.lt.s32.totalorder %s165_s24, %s161_s23 }
   0xe   :  { %p168_p6 = por %p167_p5, %p166_p4 }
  0x10   :  { %p169_p7 = pnand %p168_p6, %p162_p3 }
  0x12   :  { %172 = shalt.err (!%p169_p7)
}
  0x13   :  { %32 = dma.hbm_to_vmem [thread:$0]  %s337_s1, 16, %s30_s13, [#allocation6]  }
  0x14   :  { %s173_s29 = scalar_lea.hbm %s336_s0, 128 }
  0x15   :  { %p174_p8 = scmp.ne.s32.totalorder %s336_s0, %s173_s29  ;;  %p177_p9 = scmp.lt.u32.totalorder %s173_s29, %s336_s0 }
  0x17   :  { %p179_p10 = pnand %p177_p9, %p174_p8 }
  0x19   :  { %182 = shalt.err (!%p179_p10)
}
  0x1a   :  { %s183_s7 = scalar_lea.vmem %s271_s15, 128  ;;  %p188_p12 = scmp.lt.s32.totalorder %s271_s15, %s271_s15 }
  0x1b   :  { %p184_p11 = scmp.ne.s32.totalorder %s271_s15, %s183_s7  ;;  %p189_p13 = scmp.lt.s32.totalorder %s183_s7, %s183_s7 }
  0x1d   :  { %p190_p0 = por %p189_p13, %p188_p12 }
  0x1f   :  { %p191_p1 = pnand %p190_p0, %p184_p11 }
  0x21   :  { %194 = shalt.err (!%p191_p1)
}
  0x22   :  { %s247_s1 = smov 64   ;;  %s248_s8 = smov 4  }
  0x23   :  { %22 = dma.hbm_to_vmem [thread:$0]  %s336_s0, 128, %s271_s15, [#allocation3], %s247_s1, %s247_s1, %s248_s8  }
  0x24   :  { %s249_s11 = smov [#allocation7]   ;;  %s195_s16 = scalar_lea.hbm %s338_s2, 16 }
  0x25   :  { %s39_s12 = sshll.u32 %s249_s11, 4  ;;  %p196_p2 = scmp.ne.s32.totalorder %s338_s2, %s195_s16  ;;  %s40_s12 = int_to_ptr.vmem [resolvable:$true] %s39_s12 }
  0x26   :  { %p199_p3 = scmp.lt.u32.totalorder %s195_s16, %s338_s2 }
  0x28   :  { %p201_p4 = pnand %p199_p3, %p196_p2 }
  0x2a   :  { %204 = shalt.err (!%p201_p4)
}
  0x2b   :  { %s205_s21 = scalar_lea.vmem %s40_s12, 16  ;;  %s209_s0 = scalar_lea.vmem %s40_s12, 32 }
  0x2c   :  { %p206_p5 = scmp.ne.s32.totalorder %s40_s12, %s205_s21  ;;  %p210_p6 = scmp.lt.s32.totalorder %s40_s12, %s40_s12 }
  0x2d   :  { %p211_p7 = scmp.lt.s32.totalorder %s209_s0, %s205_s21 }
  0x2f   :  { %p212_p8 = por %p211_p7, %p210_p6 }
  0x31   :  { %p213_p9 = pnand %p212_p8, %p206_p5 }
  0x33   :  { %216 = shalt.err (!%p213_p9)
}
  0x34   :  { %42 = dma.hbm_to_vmem [thread:$0]  %s338_s2, 16, %s40_s12, [#allocation6]  }
  0x35   :  { %239 = dma.done.wait [#allocation3], 128  }
  0x36   :  { %240 = vsyncadd [#allocation3], 4294967168 }
  0x37   :  { %241 = dma.done.wait [#allocation6], 32  }
  0x38   :  { %242 = vsyncadd [#allocation6], 4294967264  ;;  %v138_v0 = vld [vmem:[#allocation2] sm:$0xff]   ;;  %vm56_vm0 = vcmask 261120   ;;  %v131_v22 = vld [vmem:[#allocation5] ss:$0 sm:$0xff] }
  0x39   :  { %v139_v1 = vunpack.c.l.bf16 %v138_v0  ;;  %v140_v2 = vunpack.c.h.bf16 %v138_v0  ;;  %v132_v24 = vld [vmem:[#allocation7] ss:$0 sm:$0xff]  ;;  %vm110_vm1 = vcmask 257024   ;;  %s250_s2 = smov [#allocation8]  }
  0x3a   :  { %s118_s23 = sshll.u32 %s250_s2, 4  ;;  %s119_s23 = int_to_ptr.vmem [resolvable:$true] %s118_s23 }
  0x3b   :  { %v57_v3 = vsel %vm56_vm0, %v139_v1, 0.0  ;;  %v60_v4 = vsel %vm56_vm0, %v140_v2, 0.0  ;;  %s217_s24 = scalar_lea.vmem %s119_s23, 128  ;;  %p222_p11 = scmp.lt.s32.totalorder %s119_s23, %s119_s23 }
  0x3c   :  { %58 = vadd.xlane.f32.xlu0 %v57_v3  ;;  %p218_p10 = scmp.ne.s32.totalorder %s119_s23, %s217_s24  ;;  %p223_p12 = scmp.lt.s32.totalorder %s217_s24, %s217_s24 }
  0x3e   :  { %p224_p13 = por %p223_p12, %p222_p11 }
  0x40   :  { %61 = vadd.xlane.f32.xlu0 %v60_v4  ;;  %p225_p0 = pnand %p224_p13, %p218_p10 }
  0xc9   :  { %v59_v5 = vpop.xlane.xlu0 %58 }
  0xca   :  { %v64_v6 = vmul.f32 0.03125, %v59_v5 }
  0xcc   :  { %v66_v7 = vsub.f32 %v139_v1, %v64_v6 }
  0xcd   :  { %v62_v8 = vpop.xlane.xlu0 %61 }
  0xce   :  { %v65_v9 = vmul.f32 0.03125, %v62_v8  ;;  %v68_v10 = vmul.f32 %v66_v7, %v66_v7 }
  0xd0   :  { %v67_v11 = vsub.f32 %v140_v2, %v65_v9  ;;  %v70_v12 = vsel %vm56_vm0, %v68_v10, 0.0 }
  0xd1   :  { %71 = vadd.xlane.f32.xlu1 %v70_v12 }
  0xd2   :  { %v69_v13 = vmul.f32 %v67_v11, %v67_v11 }
  0xd4   :  { %v73_v14 = vsel %vm56_vm0, %v69_v13, 0.0 }
  0xd5   :  { %74 = vadd.xlane.f32.xlu1 %v73_v14 }
 0x15e   :  { %v72_v15 = vpop.xlane.xlu1 %71 }
 0x15f   :  { %v76_v16 = vmul.f32 0.03125, %v72_v15 }
 0x161   :  { %v78_v17 = vadd.f32 1e-06, %v76_v16 }
 0x162   :  { %v75_v18 = vpop.xlane.xlu1 %74 }
 0x163   :  { %147 = vrsqrt.f32 %v78_v17  ;;  %v77_v19 = vmul.f32 0.03125, %v75_v18 }
 0x165   :  { %v79_v20 = vadd.f32 1e-06, %v77_v19 }
 0x167   :  { %149 = vrsqrt.f32 %v79_v20 }
 0x16d   :  { %v148_v21 = vpop.eup %147 }
 0x16e   :  { %v82_v23 = vmul.f32 %v148_v21, %v66_v7 }
 0x170   :  { %v91_v25 = vmul.f32 %v131_v22, %v82_v23 }
 0x171   :  { %v150_v26 = vpop.eup %149 }
 0x172   :  { %v83_v27 = vmul.f32 %v150_v26, %v67_v11  ;;  %v100_v28 = vadd.f32 %v132_v24, %v91_v25 }
 0x174   :  { %v92_v29 = vmul.f32 %v131_v22, %v83_v27  ;;  %v135_v30 = vpack.c.bf16 %v100_v28, %v100_v28 }
 0x176   :  { %v101_v31 = vadd.f32 %v132_v24, %v92_v29  ;;  %111 = vst.msk [vmem:[#allocation8] sm:$0xf] %vm110_vm1, %v135_v30 }
 0x178   :  { %v136_v32 = vpack.c.bf16 %v101_v31, %v101_v31 }
 0x17a   :  { %112 = vst.msk [vmem:[#allocation8 + $0x4] sm:$0xf] %vm110_vm1, %v136_v32 }
 0x17b   :  { %228 = shalt.err (!%p225_p0)
}
 0x17c   :  { %s229_s27 = scalar_lea.hbm %s339_s3, 128 }
 0x17d   :  { %p230_p1 = scmp.ne.s32.totalorder %s339_s3, %s229_s27  ;;  %p233_p2 = scmp.lt.u32.totalorder %s229_s27, %s339_s3 }
 0x17f   :  { %p235_p3 = pnand %p233_p2, %p230_p1 }
 0x181   :  { %238 = shalt.err (!%p235_p3)
}
 0x182   :  { %124 = dma.vmem_to_hbm [thread:$0]  %s119_s23, 128, %s339_s3, [#allocation4], %s247_s1, %s247_s1, %s248_s8  }
 0x183   :  { %243 = dma.done.wait [#allocation4], 128  }
 0x184   :  { %244 = vsyncadd [#allocation4], 4294967168 }
 0x185   :  { %128 = vsyncpa [#allocation3], 1 }
 0x186   :  { %129 = vsyncpa [#allocation6], 1 }
 0x187   :  { %130 = vsyncpa [#allocation4], 1 }

</bundles_post_ra>
